<compile_context>
chip_gen: v7x
topology: tpu7x:2x2x1
jax: 0.10.0
libtpu: 0.0.40
codegen_flags: <defaults>
</compile_context>

<pallas_src>
import functools

import jax
import jax.numpy as jnp
from jax import lax
from jax.experimental import pallas as pl
from jax.experimental.pallas import tpu as pltpu


# ----------------------------------------------------------------------------
# Fused kernel: in-kernel adj/norm build + [GraphConv]* + [Linear] head
# ----------------------------------------------------------------------------
def _make_fused_kernel(config, n_nodes, n_edges):
    """config: tuple of ('GraphConv'|'Linear', (fin, fout)) — baked in statically."""

    def kernel(e_ref, x_ref, *rest):
        out_ref = rest[-1]
        params = rest[:-1]                                  # (w0, b0, w1, b1, ...)

        # ---- in-kernel adjacency + degree-norm build (no wrapper scatter ops) ----
        src = e_ref[0:1, :]                                 # (1, E) i32
        dst = e_ref[1:2, :]                                 # (1, E) i32
        node_ids = lax.broadcasted_iota(jnp.int32, (n_nodes, n_edges), 0)
        src_oh = (node_ids == src).astype(jnp.float32)      # (N, E) one-hot per edge
        dst_oh = (node_ids == dst).astype(jnp.float32)      # (N, E)
        # adj_t[d, s] = #edges s -> d  (contract over E on the MXU; A @ B.T pattern).
        adj_t = lax.dot_general(dst_oh, src_oh, (((1,), (1,)), ((), ())),
                                preferred_element_type=jnp.float32)      # (N, N)
        # out-degree (== degree(e_subgraph[0], N)) in both layouts -> no transposes.
        deg_col = jnp.sum(src_oh, axis=1, keepdims=True)    # (N, 1)  cross-lane reduce
        deg_row = jnp.sum(adj_t, axis=0, keepdims=True)     # (1, N)  cross-sublane reduce
        norm_col = lax.rsqrt(jnp.maximum(deg_col, 1.0))     # dst-side norm (f32 epilogue)
        norm_row = lax.rsqrt(jnp.maximum(deg_row, 1.0))     # src-side norm (folded)
        adj = (adj_t * norm_row).astype(jnp.bfloat16)       # src-norm folded once

        h = x_ref[...]                                      # f32 [N, F_in]
        idx = 0
        for name, (fin, fout) in config:
            w = params[idx][...]                            # bf16 [fin, fout(_pad)]
            b = params[idx + 1][...]                        # f32  [1,   fout(_pad)]
            if name == 'GraphConv':
                x = h.astype(jnp.bfloat16)
                if fin > fout:                              # project, then aggregate
                    x = jnp.dot(x, w, preferred_element_type=jnp.float32
                                ).astype(jnp.bfloat16)
                    rst = jnp.dot(adj, x, preferred_element_type=jnp.float32)
                else:                                       # aggregate, then project
                    rst = jnp.dot(adj, x, preferred_element_type=jnp.float32
                                  ).astype(jnp.bfloat16)
                    rst = jnp.dot(rst, w, preferred_element_type=jnp.float32)
                h = jnp.maximum(rst * norm_col + b, 0.0)    # f32 epilogue: norm+bias+relu
            else:                                           # Linear head: x @ W.T + b
                h = jnp.dot(h.astype(jnp.bfloat16), w,
                            preferred_element_type=jnp.float32) + b
            idx += 2

        out_ref[...] = h                                    # lane-dense (N, 128) store

    return kernel


@functools.partial(jax.jit, static_argnums=(0, 1))
def _fused_forward(config, out_dim, kernel_params, n_subgraph, e_subgraph, features):
    n = n_subgraph.shape[0]
    e = e_subgraph.shape[1]
    out_pad = kernel_params[-1].shape[1]                    # padded lanes of the head

    vmem = pl.BlockSpec(memory_space=pltpu.MemorySpace.VMEM)
    h = pl.pallas_call(
        _make_fused_kernel(config, n, e),
        out_shape=jax.ShapeDtypeStruct((n, out_pad), jnp.float32),
        in_specs=[vmem] * (2 + len(kernel_params)),
        out_specs=vmem,
    )(e_subgraph.astype(jnp.int32), features.astype(jnp.float32), *kernel_params)

    # Kernel wrote a lane-dense slab; slice the true class columns here (inside the jit).
    return h[:, :out_dim]


# ----------------------------------------------------------------------------
# Classifier (parameter construction + one-time kernel-param preprocessing)
# ----------------------------------------------------------------------------
class Classifier:
    def __init__(self, config, key):
        # Hashable static config (jit static arg / kernel construction).
        self.config = tuple((name, tuple(param)) for name, param in config)

        # Raw f32 parameters, same layout/init as the PyTorch module.
        self.vars = []
        for (name, (fin, fout)) in self.config:
            key, k = jax.random.split(key)
            if name == 'Linear':
                # kaiming_normal_ on torch weight (fout, fin): std = sqrt(2/fin)
                w = jax.random.normal(k, (fout, fin), jnp.float32) * jnp.sqrt(2.0 / fin)
                self.vars += [w, jnp.zeros((fout,), jnp.float32)]
            elif name == 'GraphConv':
                # xavier_uniform_ on (fin, fout): bound = sqrt(6/(fin+fout))
                bound = jnp.sqrt(6.0 / (fin + fout))
                w = jax.random.uniform(k, (fin, fout), jnp.float32, -bound, bound)
                self.vars += [w, jnp.zeros((fout,), jnp.float32)]

        # One-time kernel-parameter preprocessing (hoisted out of forward):
        #   GraphConv weight [fin,fout] -> bf16 ; Linear weight [fout,fin] -> W.T bf16
        #   bias -> [1,fout] f32 ; last layer zero-padded to 128 lanes (lane-dense vst).
        self.out_dim = self.config[-1][1][1]
        self.out_pad = ((self.out_dim + 127) // 128) * 128
        kparams = []
        last = len(self.config) - 1
        for i, (name, (fin, fout)) in enumerate(self.config):
            w, b = self.vars[2 * i], self.vars[2 * i + 1]
            w_k = w.T if name == 'Linear' else w            # -> [fin, fout]
            b_k = b.reshape(1, fout)
            if i == last:
                pad = self.out_pad - fout
                w_k = jnp.pad(w_k, ((0, 0), (0, pad)))
                b_k = jnp.pad(b_k, ((0, 0), (0, pad)))
            kparams.append(w_k.astype(jnp.bfloat16))
            kparams.append(b_k.astype(jnp.float32))
        self.kernel_params = tuple(jax.device_put(p) for p in kparams)

    def forward(self, n_subgraph, e_subgraph, to_fetch, features):
        # `to_fetch` intentionally unused — the original module returns (h, h) untouched.
        h = _fused_forward(self.config, self.out_dim, self.kernel_params,
                           n_subgraph, e_subgraph, features)
        return h, h


# ----------------------------------------------------------------------------
# Pure-JAX references for verification.
#   use_bf16=True  : mirrors the kernel's math (folded src-norm bf16 adj, f32 accum)
#   use_bf16=False : exact f32 semantics of the original PyTorch module
# ----------------------------------------------------------------------------
def _reference_forward(config, params, n_subgraph, e_subgraph, features, use_bf16):
    n = n_subgraph.shape[0]
    src, dst = e_subgraph[0], e_subgraph[1]
    adj_t = jnp.zeros((n, n), jnp.float32).at[dst, src].add(1.0)
    deg = jnp.zeros((n, 1), jnp.float32).at[src, 0].add(1.0)
    norm = lax.rsqrt(jnp.maximum(deg, 1.0))
    adj_bf16 = (adj_t * norm.reshape(1, n)).astype(jnp.bfloat16)   # kernel's folded adj

    h = features.astype(jnp.float32)
    idx = 0
    for name, (fin, fout) in config:
        w, b = params[idx], params[idx + 1]
        if name == 'GraphConv':
            if use_bf16:
                w_mm = w.astype(jnp.bfloat16)
                x = h.astype(jnp.bfloat16)
                if fin > fout:
                    x = jnp.dot(x, w_mm,
                                preferred_element_type=jnp.float32).astype(jnp.bfloat16)
                    rst = jnp.dot(adj_bf16, x, preferred_element_type=jnp.float32)
                else:
                    rst = jnp.dot(adj_bf16, x,
                                  preferred_element_type=jnp.float32).astype(jnp.bfloat16)
                    rst = jnp.dot(rst, w_mm, preferred_element_type=jnp.float32)
            else:
                x = h * norm
                if fin > fout:
                    rst = jnp.dot(adj_t, jnp.dot(x, w))
                else:
                    rst = jnp.dot(jnp.dot(adj_t, x), w)
            h = jnp.maximum(rst * norm + b[None, :], 0.0)
        else:  # Linear
            if use_bf16:
                h = jnp.dot(h.astype(jnp.bfloat16), w.T.astype(jnp.bfloat16),
                            preferred_element_type=jnp.float32) + b[None, :]
            else:
                h = jnp.dot(h, w.T) + b[None, :]
        idx += 2
    return h


# ----------------------------------------------------------------------------
if __name__ == "__main__":
    key = jax.random.PRNGKey(0)
    k_feat, k_edge, k_param = jax.random.split(key, 3)

    N = 16        # nodes
    E = 48        # edges
    F_IN = 32     # input feature dim
    H1 = 32       # GraphConv 1: 32 -> 32  (aggregate-then-project branch)
    H2 = 16       # GraphConv 2: 32 -> 16  (project-then-aggregate branch)
    C = 8         # Linear head classes

    config = [('GraphConv', (F_IN, H1)),
              ('GraphConv', (H1, H2)),
              ('Linear', (H2, C))]

    n_subgraph = jnp.arange(N, dtype=jnp.int32)                         # node ids
    e_subgraph = jax.random.randint(k_edge, (2, E), 0, N, jnp.int32)    # edge_index
    to_fetch = jnp.arange(N, dtype=jnp.int32)                           # unused by forward
    features = jax.random.normal(k_feat, (N, F_IN), jnp.float32)

    model = Classifier(config, k_param)
    out, out2 = model.forward(n_subgraph, e_subgraph, to_fetch, features)
    out = jax.block_until_ready(out)

    ref_bf16 = _reference_forward(model.config, model.vars, n_subgraph, e_subgraph,
                                  features, use_bf16=True)
    ref_f32 = _reference_forward(model.config, model.vars, n_subgraph, e_subgraph,
                                 features, use_bf16=False)

    assert out.shape == (N, C)
    # Tight check vs. the bf16-operand / f32-accum reference (same math as the kernel).
    assert jnp.allclose(out, ref_bf16, atol=3e-3, rtol=3e-3), "mismatch vs bf16 reference"
    # Looser sanity check vs. exact f32 semantics of the original PyTorch module.
    assert jnp.allclose(out, ref_f32, atol=1e-1, rtol=1e-1), "mismatch vs f32 reference"

    print("KERNEL_OK")
</pallas_src>

<mosaic_0001>
module attributes {stable_mosaic.version = 11 : i64} {
  func.func @kernel(%arg0: memref<2x48xi32, #tpu.memory_space<vmem>>, %arg1: memref<16x32xf32, #tpu.memory_space<vmem>>, %arg2: memref<32x32xbf16, #tpu.memory_space<vmem>>, %arg3: memref<1x32xf32, #tpu.memory_space<vmem>>, %arg4: memref<32x16xbf16, #tpu.memory_space<vmem>>, %arg5: memref<1x16xf32, #tpu.memory_space<vmem>>, %arg6: memref<16x128xbf16, #tpu.memory_space<vmem>>, %arg7: memref<1x128xf32, #tpu.memory_space<vmem>>, %arg8: memref<16x128xf32, #tpu.memory_space<vmem>>) attributes {dimension_semantics = [], scalar_prefetch = 0 : i64, scratch_operands = 0 : i64, tpu.core_type = #tpu.core_type<tc>} {
    %c0 = arith.constant 0 : index
    %c0_0 = arith.constant 0 : index
    %0 = vector.load %arg0[%c0, %c0_0] : memref<2x48xi32, #tpu.memory_space<vmem>>, vector<1x48xi32>
    %c1 = arith.constant 1 : index
    %c0_1 = arith.constant 0 : index
    %1 = vector.load %arg0[%c1, %c0_1] : memref<2x48xi32, #tpu.memory_space<vmem>>, vector<1x48xi32>
    %2 = tpu.iota {dimensions = array<i32: 0>} : vector<16x48xi32>
    %3 = vector.broadcast %0 : vector<1x48xi32> to vector<16x48xi32>
    %4 = arith.cmpi eq, %2, %3 : vector<16x48xi32>
    %5 = arith.extui %4 : vector<16x48xi1> to vector<16x48xi32>
    %6 = arith.sitofp %5 : vector<16x48xi32> to vector<16x48xf32>
    %7 = vector.broadcast %1 : vector<1x48xi32> to vector<16x48xi32>
    %8 = arith.cmpi eq, %2, %7 : vector<16x48xi32>
    %9 = arith.extui %8 : vector<16x48xi1> to vector<16x48xi32>
    %10 = arith.sitofp %9 : vector<16x48xi32> to vector<16x48xf32>
    %cst = arith.constant dense<0.000000e+00> : vector<16x16xf32>
    %11 = tpu.matmul %10, %6, %cst {dimension_numbers = #tpu.dot_dimension_numbers<[1], [1], [0], [0], [0, 0, 1, 0], [], []>} : vector<16x48xf32>, vector<16x48xf32>, vector<16x16xf32> -> vector<16x16xf32>
    %cst_2 = arith.constant dense<0.000000e+00> : vector<16xf32>
    %12 = vector.multi_reduction <add>, %6, %cst_2 [1] : vector<16x48xf32> to vector<16xf32>
    %13 = vector.shape_cast %12 : vector<16xf32> to vector<16x1xf32>
    %cst_3 = arith.constant dense<0.000000e+00> : vector<16xf32>
    %14 = vector.multi_reduction <add>, %11, %cst_3 [0] : vector<16x16xf32> to vector<16xf32>
    %15 = vector.shape_cast %14 : vector<16xf32> to vector<1x16xf32>
    %cst_4 = arith.constant 1.000000e+00 : f32
    %16 = vector.broadcast %cst_4 : f32 to vector<16x1xf32>
    %17 = arith.maximumf %13, %16 : vector<16x1xf32>
    %18 = math.rsqrt %17 : vector<16x1xf32>
    %cst_5 = arith.constant 1.000000e+00 : f32
    %19 = vector.broadcast %cst_5 : f32 to vector<1x16xf32>
    %20 = arith.maximumf %15, %19 : vector<1x16xf32>
    %21 = math.rsqrt %20 : vector<1x16xf32>
    %22 = vector.broadcast %21 : vector<1x16xf32> to vector<16x16xf32>
    %23 = arith.mulf %11, %22 : vector<16x16xf32>
    %24 = arith.truncf %23 : vector<16x16xf32> to vector<16x16xbf16>
    %c0_6 = arith.constant 0 : index
    %c0_7 = arith.constant 0 : index
    %25 = vector.load %arg1[%c0_6, %c0_7] : memref<16x32xf32, #tpu.memory_space<vmem>>, vector<16x32xf32>
    %c0_8 = arith.constant 0 : index
    %c0_9 = arith.constant 0 : index
    %26 = vector.load %arg2[%c0_8, %c0_9] : memref<32x32xbf16, #tpu.memory_space<vmem>>, vector<32x32xbf16>
    %c0_10 = arith.constant 0 : index
    %c0_11 = arith.constant 0 : index
    %27 = vector.load %arg3[%c0_10, %c0_11] : memref<1x32xf32, #tpu.memory_space<vmem>>, vector<1x32xf32>
    %28 = arith.truncf %25 : vector<16x32xf32> to vector<16x32xbf16>
    %cst_12 = arith.constant dense<0.000000e+00> : vector<16x32xf32>
    %29 = tpu.matmul %24, %28, %cst_12 {dimension_numbers = #tpu.dot_dimension_numbers<[1], [0], [0], [1], [0, 0, 1, 1], [], []>} : vector<16x16xbf16>, vector<16x32xbf16>, vector<16x32xf32> -> vector<16x32xf32>
    %30 = arith.truncf %29 : vector<16x32xf32> to vector<16x32xbf16>
    %cst_13 = arith.constant dense<0.000000e+00> : vector<16x32xf32>
    %31 = tpu.matmul %30, %26, %cst_13 {dimension_numbers = #tpu.dot_dimension_numbers<[1], [0], [0], [1], [0, 0, 1, 1], [], []>} : vector<16x32xbf16>, vector<32x32xbf16>, vector<16x32xf32> -> vector<16x32xf32>
    %32 = vector.broadcast %18 : vector<16x1xf32> to vector<16x32xf32>
    %33 = arith.mulf %31, %32 : vector<16x32xf32>
    %34 = vector.broadcast %27 : vector<1x32xf32> to vector<16x32xf32>
    %35 = arith.addf %33, %34 : vector<16x32xf32>
    %cst_14 = arith.constant 0.000000e+00 : f32
    %36 = vector.broadcast %cst_14 : f32 to vector<16x32xf32>
    %37 = arith.maximumf %35, %36 : vector<16x32xf32>
    %c0_15 = arith.constant 0 : index
    %c0_16 = arith.constant 0 : index
    %38 = vector.load %arg4[%c0_15, %c0_16] : memref<32x16xbf16, #tpu.memory_space<vmem>>, vector<32x16xbf16>
    %c0_17 = arith.constant 0 : index
    %c0_18 = arith.constant 0 : index
    %39 = vector.load %arg5[%c0_17, %c0_18] : memref<1x16xf32, #tpu.memory_space<vmem>>, vector<1x16xf32>
    %40 = arith.truncf %37 : vector<16x32xf32> to vector<16x32xbf16>
    %cst_19 = arith.constant dense<0.000000e+00> : vector<16x16xf32>
    %41 = tpu.matmul %40, %38, %cst_19 {dimension_numbers = #tpu.dot_dimension_numbers<[1], [0], [0], [1], [0, 0, 1, 1], [], []>} : vector<16x32xbf16>, vector<32x16xbf16>, vector<16x16xf32> -> vector<16x16xf32>
    %42 = arith.truncf %41 : vector<16x16xf32> to vector<16x16xbf16>
    %cst_20 = arith.constant dense<0.000000e+00> : vector<16x16xf32>
    %43 = tpu.matmul %24, %42, %cst_20 {dimension_numbers = #tpu.dot_dimension_numbers<[1], [0], [0], [1], [0, 0, 1, 1], [], []>} : vector<16x16xbf16>, vector<16x16xbf16>, vector<16x16xf32> -> vector<16x16xf32>
    %44 = vector.broadcast %18 : vector<16x1xf32> to vector<16x16xf32>
    %45 = arith.mulf %43, %44 : vector<16x16xf32>
    %46 = vector.broadcast %39 : vector<1x16xf32> to vector<16x16xf32>
    %47 = arith.addf %45, %46 : vector<16x16xf32>
    %cst_21 = arith.constant 0.000000e+00 : f32
    %48 = vector.broadcast %cst_21 : f32 to vector<16x16xf32>
    %49 = arith.maximumf %47, %48 : vector<16x16xf32>
    %c0_22 = arith.constant 0 : index
    %c0_23 = arith.constant 0 : index
    %50 = vector.load %arg6[%c0_22, %c0_23] : memref<16x128xbf16, #tpu.memory_space<vmem>>, vector<16x128xbf16>
    %c0_24 = arith.constant 0 : index
    %c0_25 = arith.constant 0 : index
    %51 = vector.load %arg7[%c0_24, %c0_25] : memref<1x128xf32, #tpu.memory_space<vmem>>, vector<1x128xf32>
    %52 = arith.truncf %49 : vector<16x16xf32> to vector<16x16xbf16>
    %cst_26 = arith.constant dense<0.000000e+00> : vector<16x128xf32>
    %53 = tpu.matmul %52, %50, %cst_26 {dimension_numbers = #tpu.dot_dimension_numbers<[1], [0], [0], [1], [0, 0, 1, 1], [], []>} : vector<16x16xbf16>, vector<16x128xbf16>, vector<16x128xf32> -> vector<16x128xf32>
    %54 = vector.broadcast %51 : vector<1x128xf32> to vector<16x128xf32>
    %55 = arith.addf %53, %54 : vector<16x128xf32>
    %c0_27 = arith.constant 0 : index
    %c0_28 = arith.constant 0 : index
    %56 = vector.load %arg8[%c0_27, %c0_28] : memref<16x128xf32, #tpu.memory_space<vmem>>, vector<16x128xf32>
    tpu.vector_store %arg8[%c0_27, %c0_28], %55 {strides = array<i32>} : memref<16x128xf32, #tpu.memory_space<vmem>>, vector<16x128xf32>,
    return
  }
}

</mosaic_0001>

<bundles_post_ra>
// kernel: _fused_forward.1
= control target key start
LH: loop header
LB: loop body
LE: loop exit
PB: predicated region body
PF: predicated region fallthrough
CT: control target
= control target key end

     0   :  { %13 = vsyncpa [#allocation3], 0  ;;  %s613_s27 = smov [#allocation2]   ;;  %s745_s0 = inlined_call_operand.vmem [shape: s32[2,48], index: 0, kind: input, shape index: {}]   ;;  %s746_s1 = inlined_call_operand.vmem [shape: f32[16,32], index: 1, kind: input, shape index: {}]   ;;  %s747_s2 = inlined_call_operand.hbm [shape: bf16[32,32], index: 2, kind: input, shape index: {}]   ;;  %s748_s3 = inlined_call_operand.vmem [shape: f32[1,32], index: 3, kind: input, shape index: {}]   ;;  %s749_s4 = inlined_call_operand.vmem [shape: bf16[32,16], index: 4, kind: input, shape index: {}]   ;;  %s750_s5 = inlined_call_operand.vmem [shape: f32[1,16], index: 5, kind: input, shape index: {}]   ;;  %s751_s6 = inlined_call_operand.vmem [shape: bf16[16,128], index: 6, kind: input, shape index: {}]   ;;  %s752_s7 = inlined_call_operand.vmem [shape: f32[1,128], index: 7, kind: input, shape index: {}]   ;;  %s753_s8 = inlined_call_operand.vmem [shape: f32[16,128], index: 8, kind: output, shape index: {}]  }
   0x1   :  { %s23_s28 = sshll.u32 %s613_s27, 4  ;;  %s589_s9 = scalar_lea.hbm %s747_s2, 256  ;;  %s24_s28 = int_to_ptr.vmem [resolvable:$true] %s23_s28 }
   0x2   :  { %p590_p0 = scmp.ne.s32.totalorder %s747_s2, %s589_s9  ;;  %p593_p1 = scmp.lt.u32.totalorder %s589_s9, %s747_s2 }
   0x4   :  { %p595_p2 = pnand %p593_p1, %p590_p0 }
   0x6   :  { %598 = shalt.err (!%p595_p2)
}
   0x7   :  { %s599_s14 = scalar_lea.vmem %s24_s28, 256  ;;  %p604_p4 = scmp.lt.s32.totalorder %s24_s28, %s24_s28 }
   0x8   :  { %p600_p3 = scmp.ne.s32.totalorder %s24_s28, %s599_s14  ;;  %p605_p5 = scmp.lt.s32.totalorder %s599_s14, %s599_s14 }
   0xa   :  { %p606_p6 = por %p605_p5, %p604_p4 }
   0xc   :  { %p607_p7 = pnand %p606_p6, %p600_p3 }
   0xe   :  { %610 = shalt.err (!%p607_p7)
}
   0xf   :  { %s614_s15 = smov 64   ;;  %s615_s16 = smov 4  }
  0x10   :  { %29 = dma.hbm_to_vmem [thread:$0]  %s747_s2, 256, %s24_s28, [#allocation3], %s614_s15, %s614_s15, %s615_s16  }
  0x11   :  { %611 = dma.done.wait [#allocation3], 256  }
  0x12   :  { %612 = vsyncadd [#allocation3], 4294967040  ;;  %v46_v0 = vlaneseq  ;;  %v616_v1 = vmov 0.0   ;;  %vm69_vm0 = vcmask 392192   ;;  %v487_v4 = vld [vmem:[%s745_s0] ss:$0 sm:$0xff] }
  0x13   :  { %533 = vmatprep.subr.bf16.mxu1 %v616_v1  ;;  %v490_v5 = vld [vmem:[%s745_s0 + $0x1] ss:$0 sm:$0xff]  ;;  %vm568_vm4 = vmpackc.low %vm69_vm0, %vm69_vm0  ;;  %v183_v12 = vld [vmem:[%s746_s1 + $0x8] sm:$0xff]  ;;  %vm617_vm6 = vmmov 0   ;;  %vm163_vm7 = vcmask 130048   ;;  %vm247_vm8 = vcmask 261120  }
  0x14   :  { %v47_v2 = vshrl.u32 %v46_v0, 7  ;;  %v182_v11 = vld [vmem:[%s746_s1] sm:$0xff]  ;;  %535 = vmatprep.mubr.msk.bf16.mxu1 %vm617_vm6, %v616_v1  ;;  %v579_v31 = vld [vmem:[#allocation2 + $0x8] sm:$0xff]  }
  0x15   :  { %v189_v13 = vpack.c.bf16 %v183_v12, %v182_v11  ;;  %v578_v29 = vld [vmem:[#allocation2] sm:$0xff]   ;;  %v581_v40 = vld [vmem:[%s749_s4 + $0x8] sm:$0xff]  }
  0x16   :  { %v48_v3 = vadd.s32 8, %v47_v2  ;;  %vm53_vm1 = vcmp.eq.s32.totalorder %v47_v2, %v487_v4  ;;  %vm63_vm3 = vcmp.eq.s32.totalorder %v47_v2, %v490_v5  ;;  %v580_v39 = vld [vmem:[%s749_s4] sm:$0xff]  }
  0x17   :  { %v488_v6 = vsel %vm53_vm1, 1.0, %v616_v1  ;;  %v491_v8 = vsel %vm63_vm3, 1.0, %v616_v1  ;;  %534 = vmatpush3.bf16.msra.mxu1 %v189_v13  ;;  %v501_v47 = vld [vmem:[%s748_s3] ss:$0 sm:$0xff] }
  0x18   :  { %vm54_vm2 = vcmp.eq.s32.totalorder %v48_v3, %v487_v4  ;;  %530 = vmatprep.mubr.msk.f32.mxu0 %vm69_vm0, %v491_v8  ;;  %vm64_vm5 = vcmp.eq.s32.totalorder %v48_v3, %v490_v5  ;;  %539 = vmatprep.subr.bf16.mxu1 %v616_v1  ;;  %v157_v32 = vsel %vm69_vm0, %v488_v6, 0.0  ;;  %v582_v0 = vld [vmem:[%s751_s6] sm:$0xff]  }
  0x19   :  { %v489_v7 = vsel %vm54_vm2, 1.0, %v616_v1  ;;  %v492_v10 = vsel %vm64_vm5, 1.0, %v616_v1  ;;  %158 = vadd.xlane.f32.xlu0 %v157_v32  ;;  %v506_v2 = vld [vmem:[%s750_s5] ss:$0 sm:$0xff] }
  0x1a   :  { %v567_v9 = vpack.c.bf16 %v489_v7, %v488_v6  ;;  %v160_v33 = vsel %vm69_vm0, %v489_v7, 0.0  ;;  %v507_v13 = vld [vmem:[%s752_s7] ss:$0 sm:$0xff] }
  0x1c   :  { %569 = vmatprep.subr.msk.bf16.mxu0 %vm568_vm4, %v567_v9 }
  0x1d   :  { %572 = vmatpush3.bf16.xpose.msk.msra.mxu0 %vm568_vm4, %v567_v9  ;;  %161 = vadd.xlane.f32.xlu0 %v160_v33 }
  0x1e   :  { %547 = vmatprep.subr.bf16.mxu0 %v616_v1 }
  0x24   :  { %531 = vmatmul.mubr.msk.f32.vlgmr.msra.gmra.mrb[0].mxu0 %vm69_vm0, %v492_v10 }
  0x25   :  { %551 = vmatprep.mubr.msk.bf16.mxu0 %vm617_vm6, %v616_v1  ;;  %548 = vmatpush3.bf16.msra.mxu0 %v580_v39 }
  0x26   :  { %549 = vmatprep.subr.bf16.mxu0 %v616_v1 }
  0x29   :  { %550 = vmatpush3.bf16.msra.mxu0 %v581_v40 }
  0x2a   :  { %561 = vmatprep.subr.bf16.mxu0 %v616_v1 }
  0xa6   :  { %v159_v41 = vpop.xlane.xlu0 %158 }
  0xa7   :  { %v173_v43 = vmax.f32 %v159_v41, 1.0 }
  0xaa   :  { %v162_v42 = vpop.xlane.xlu0 %161 }
  0xab   :  { %v174_v44 = vmax.f32 %v162_v42, 1.0 }
  0xf7   :  { %v532_v14 = vpop.f32.mrb[0].mxu0 }
  0xf8   :  { %v165_v15 = vsel %vm163_vm7, %v532_v14, 0.0  ;;  %v148_v16 = vpop.f32.mrb[1].mxu0 }
  0xf9   :  { %v164_v17 = vsel %vm163_vm7, %v148_v16, 0.0 }
  0xfa   :  { %v166_v18 = vadd.f32 %v165_v15, %v164_v17 }
  0xfc   :  { %v167_v19 = vrot.slane %v166_v18, 4 }
  0xfe   :  { %v168_v20 = vadd.f32 %v167_v19, %v166_v18 }
 0x100   :  { %v169_v21 = vrot.slane %v168_v20, 2 }
 0x102   :  { %v170_v22 = vadd.f32 %v169_v21, %v168_v20 }
 0x104   :  { %v171_v23 = vrot.slane %v170_v22, 1 }
 0x106   :  { %v172_v24 = vadd.f32 %v171_v23, %v170_v22 }
 0x108   :  { %v177_v25 = vmax.f32 %v172_v24, 1.0 }
 0x10a   :  { %583 = vrsqrt.f32 %v177_v25 }
 0x10b   :  { %585 = vrsqrt.f32 %v173_v43 }
 0x10c   :  { %587 = vrsqrt.f32 %v174_v44 }
 0x114   :  { %v584_v26 = vpop.eup %583 }
 0x115   :  { %v179_v27 = vmul.f32 %v584_v26, %v148_v16  ;;  %v180_v28 = vmul.f32 %v584_v26, %v532_v14  ;;  %v586_v45 = vpop.eup %585 }
 0x116   :  { %v588_v46 = vpop.eup %587 }
 0x117   :  { %v181_v30 = vpack.c.bf16 %v180_v28, %v179_v27 }
 0x119   :  { %536 = vmatmul.mubr.msk.bf16.vlgmr.msra.gmra.mrb[0].mxu1 %vm163_vm7, %v181_v30 }
 0x11a   :  { %540 = vmatpush3.bf16.msra.mxu1 %v578_v29  ;;  %543 = vmatprep.mubr.msk.bf16.mxu1 %vm617_vm6, %v616_v1 }
 0x11b   :  { %541 = vmatprep.subr.bf16.mxu1 %v616_v1 }
 0x11e   :  { %542 = vmatpush3.bf16.msra.mxu1 %v579_v31 }
 0x11f   :  { %555 = vmatprep.subr.bf16.mxu1 %v616_v1 }
 0x1ec   :  { %v227_v34 = vpop.f32.mrb[0].mxu1 }
 0x1ed   :  { %v537_v35 = vpop.f32.mrb[1].mxu1 }
 0x1ee   :  { %v230_v36 = vpop.f32.mrb[2].mxu1 }
 0x1ef   :  { %v234_v37 = vpack.c.bf16 %v230_v36, %v227_v34  ;;  %v538_v38 = vpop.f32.mrb[3].mxu1 }
 0x1f1   :  { %544 = vmatmul.mubr.msk.bf16.vlgmr.msra.gmra.mrb[4].mxu1 %vm247_vm8, %v234_v37 }
 0x1f2   :  { %557 = vmatprep.mubr.msk.bf16.mxu1 %vm617_vm6, %v616_v1 }
 0x2c4   :  { %v285_v48 = vpop.f32.mrb[4].mxu1 }
 0x2c5   :  { %v292_v49 = vmul.f32 %v586_v45, %v285_v48  ;;  %v545_v50 = vpop.f32.mrb[5].mxu1 }
 0x2c6   :  { %v288_v51 = vpop.f32.mrb[6].mxu1 }
 0x2c7   :  { %v300_v52 = vadd.f32 %v501_v47, %v292_v49  ;;  %v293_v53 = vmul.f32 %v588_v46, %v288_v51  ;;  %v546_v54 = vpop.f32.mrb[7].mxu1 }
 0x2c9   :  { %v301_v55 = vadd.f32 %v501_v47, %v293_v53  ;;  %v302_v56 = vmax.f32 %v300_v52, 0.0 }
 0x2cb   :  { %v303_v57 = vmax.f32 %v301_v55, 0.0 }
 0x2cd   :  { %v309_v58 = vpack.c.bf16 %v303_v57, %v302_v56 }
 0x2cf   :  { %552 = vmatmul.mubr.msk.bf16.vlgmr.msra.gmra.mrb[4].mxu0 %vm247_vm8, %v309_v58 }
 0x2d0   :  { %563 = vmatprep.mubr.msk.bf16.mxu0 %vm617_vm6, %v616_v1  ;;  %562 = vmatpush3.bf16.msra.mxu0 %v582_v0 }
 0x3a2   :  { %v359_v59 = vpop.f32.mrb[4].mxu0 }
 0x3a3   :  { %v553_v60 = vpop.f32.mrb[5].mxu0 }
 0x3a4   :  { %v362_v61 = vpop.f32.mrb[6].mxu0 }
 0x3a5   :  { %v366_v62 = vpack.c.bf16 %v362_v61, %v359_v59  ;;  %v554_v63 = vpop.f32.mrb[7].mxu0 }
 0x3a7   :  { %556 = vmatpush3.bf16.msra.mxu1 %v366_v62 }
 0x3aa   :  { %558 = vmatmul.mubr.msk.bf16.vlgmr.msra.gmra.mrb[8].mxu1 %vm163_vm7, %v181_v30 }
 0x47d   :  { %v401_v3 = vpop.f32.mrb[8].mxu1 }
 0x47e   :  { %v408_v4 = vmul.f32 %v586_v45, %v401_v3  ;;  %v559_v1 = vpop.f32.mrb[9].mxu1 }
 0x47f   :  { %v404_v5 = vpop.f32.mrb[10].mxu1 }
 0x480   :  { %v416_v6 = vadd.f32 %v506_v2, %v408_v4  ;;  %v409_v7 = vmul.f32 %v588_v46, %v404_v5  ;;  %v560_v8 = vpop.f32.mrb[11].mxu1 }
 0x482   :  { %v417_v9 = vadd.f32 %v506_v2, %v409_v7  ;;  %v418_v10 = vmax.f32 %v416_v6, 0.0 }
 0x484   :  { %v419_v11 = vmax.f32 %v417_v9, 0.0 }
 0x486   :  { %v423_v12 = vpack.c.bf16 %v419_v11, %v418_v10 }
 0x488   :  { %564 = vmatmul.mubr.msk.bf16.vlgmr.msra.gmra.mrb[8].mxu0 %vm163_vm7, %v423_v12 }
 0x55b   :  { %v473_v14 = vpop.f32.mrb[8].mxu0 }
 0x55c   :  { %v474_v15 = vadd.f32 %v507_v13, %v473_v14  ;;  %v565_v16 = vpop.f32.mrb[9].mxu0 }
 0x55d   :  { %v476_v17 = vpop.f32.mrb[10].mxu0 }
 0x55e   :  { %480 = vst [vmem:[%s753_s8] sm:$0xff] %v474_v15  ;;  %v477_v18 = vadd.f32 %v507_v13, %v476_v17  ;;  %v566_v19 = vpop.f32.mrb[11].mxu0 }
 0x560   :  { %481 = vst [vmem:[%s753_s8 + $0x8] sm:$0xff] %v477_v18 }
 0x561   :  { %486 = vsyncpa [#allocation3], 1 }

</bundles_post_ra>
